<compile_context>
chip_gen: v7x
topology: tpu7x:2x2x1
jax: 0.10.0
libtpu: 0.0.40
codegen_flags: <defaults>
</compile_context>

<pallas_src>
import functools

import jax
import jax.numpy as jnp
from jax.experimental import pallas as pl
from jax.experimental.pallas import tpu as pltpu


def _round_up(x, m):
    return (x + m - 1) // m * m


def mhsa_kernel(x_ref, wqkv_ref, bqkv_ref, wout_ref, bout_ref, out_ref, *, num_heads):
    """One batch element per grid step.

    After wrapper-side weight fusion the kernel does:
      qkv  = x @ W_qkv_eff + b_qkv_eff                (one wide MXU matmul, q already scaled)
      attn = batched-heads softmax(q k^T) v           (two batched dot_generals)
      out  = sum_h attn_h @ W_out_eff[h] + b_out_eff  (one batched dot_general + leading-dim reduce)
    """
    L = x_ref.shape[1]
    N3 = wqkv_ref.shape[1]
    N = N3 // 3
    Hd = N // num_heads

    x = x_ref[0]                                                       # (L, Din_pad) bf16

    # Fused query/key/value Linear + MHA in_proj (scale folded into the q block).
    qkv = jnp.dot(x, wqkv_ref[...],
                  preferred_element_type=jnp.float32) + bqkv_ref[...]  # (L, 3N) f32

    # Split into per-head stacks with heads on the leading (batch) dim.
    def heads(base):
        return jnp.stack(
            [qkv[:, base + h * Hd: base + (h + 1) * Hd] for h in range(num_heads)],
            axis=0)                                                     # (H, L, Hd)

    qh = heads(0).astype(jnp.bfloat16)          # already scaled by 1/sqrt(Hd)
    kh = heads(N).astype(jnp.bfloat16)
    vh = heads(2 * N).astype(jnp.bfloat16)

    # Batched-heads attention; softmax kept in f32, divide moved to the EUP.
    logits = jnp.einsum("hqd,hkd->hqk", qh, kh,
                        preferred_element_type=jnp.float32)             # (H, L, L)
    logits = logits - jnp.max(logits, axis=-1, keepdims=True)
    p = jnp.exp(logits)
    p = p * pl.reciprocal(jnp.sum(p, axis=-1, keepdims=True), approx=True)
    attn = jnp.einsum("hqk,hkd->hqd", p.astype(jnp.bfloat16), vh,
                      preferred_element_type=jnp.float32)               # (H, L, Hd)

    # Fused out_proj + final Linear with a per-head-split weight: no lane concat,
    # one contiguous lane-dense store.
    out = jnp.einsum("hqd,hdo->hqo", attn.astype(jnp.bfloat16), wout_ref[...],
                     preferred_element_type=jnp.float32)                # (H, L, Dout_pad)
    out = jnp.sum(out, axis=0) + bout_ref[...]                          # (L, Dout_pad)

    # output.relu() in the PyTorch source is not in-place -> intentionally omitted (no-op).
    out_ref[0] = out.astype(out_ref.dtype)


def multiheads_self_attention(x, params, num_heads):
    """x: (B, L, dim_input) float32. params: dict of weights in PyTorch (out, in) layout."""
    B, L, Din = x.shape
    N = params["wq"].shape[0]            # num_neurons (embed_dim)
    Dout = params["wl"].shape[0]
    Hd = N // num_heads
    scale = 1.0 / (Hd ** 0.5)
    f32, bf16 = jnp.float32, jnp.bfloat16

    # ---- algebraic fusion of consecutive Linear layers (computed in f32) ----
    wiq, wik, wiv = jnp.split(params["in_proj_weight"], 3, axis=0)      # (N, N) each
    biq, bik, biv = jnp.split(params["in_proj_bias"], 3)

    def fuse(w1, b1, w2, b2, s=1.0):
        # ((x @ w1.T + b1) @ w2.T + b2) * s  ==  x @ W_eff + b_eff
        w_eff = (w1.T.astype(f32) @ w2.T.astype(f32)) * s
        b_eff = (b1.astype(f32) @ w2.T.astype(f32) + b2.astype(f32)) * s
        return w_eff, b_eff

    wq_eff, bq_eff = fuse(params["wq"], params["bq"], wiq, biq, scale)  # scale folded into q
    wk_eff, bk_eff = fuse(params["wk"], params["bk"], wik, bik)
    wv_eff, bv_eff = fuse(params["wv"], params["bv"], wiv, biv)

    wqkv = jnp.concatenate([wq_eff, wk_eff, wv_eff], axis=1)            # (Din, 3N)
    bqkv = jnp.concatenate([bq_eff, bk_eff, bv_eff])[None, :]           # (1, 3N)

    wout_eff, bout_eff = fuse(params["out_proj_weight"], params["out_proj_bias"],
                              params["wl"], params["bl"])               # (N, Dout), (Dout,)

    # ---- lane-dense padding of the I/O feature dims (multiples of 128) ----
    Din_p = _round_up(Din, 128)
    Dout_p = _round_up(Dout, 128)
    x_p = jnp.pad(x, ((0, 0), (0, 0), (0, Din_p - Din)))
    wqkv_p = jnp.pad(wqkv, ((0, Din_p - Din), (0, 0)))
    wout_p = jnp.pad(wout_eff, ((0, 0), (0, Dout_p - Dout)))
    bout_p = jnp.pad(bout_eff, ((0, Dout_p - Dout),))[None, :]

    # Pre-split the output weight per head so the kernel never concatenates heads.
    wout_h = wout_p.reshape(num_heads, Hd, Dout_p)                      # (H, Hd, Dout_pad)

    # bf16 MXU operands; biases stay f32 (added after f32 accumulation).
    x_p = x_p.astype(bf16)
    wqkv_p = wqkv_p.astype(bf16)
    wout_h = wout_h.astype(bf16)
    bqkv = bqkv.astype(f32)
    bout_p = bout_p.astype(f32)

    kernel = functools.partial(mhsa_kernel, num_heads=num_heads)
    full = lambda a: pl.BlockSpec(a.shape, lambda b: (0,) * a.ndim)

    out_p = pl.pallas_call(
        kernel,
        out_shape=jax.ShapeDtypeStruct((B, L, Dout_p), jnp.float32),
        grid_spec=pltpu.PrefetchScalarGridSpec(
            num_scalar_prefetch=0,
            grid=(B,),
            in_specs=[
                pl.BlockSpec((1, L, Din_p), lambda b: (b, 0, 0)),
                full(wqkv_p), full(bqkv),
                full(wout_h), full(bout_p),
            ],
            out_specs=pl.BlockSpec((1, L, Dout_p), lambda b: (b, 0, 0)),
        ),
        compiler_params=pltpu.CompilerParams(
            dimension_semantics=("parallel",),
            vmem_limit_bytes=32 * 1024 * 1024,
        ),
    )(x_p, wqkv_p, bqkv, wout_h, bout_p)

    return out_p[..., :Dout]


def reference(x, params, num_heads):
    """Pure-JAX f32 reference of the exact PyTorch forward (unfused), for verification."""
    N = params["wq"].shape[0]
    Hd = N // num_heads
    scale = 1.0 / (Hd ** 0.5)
    lin = lambda t, w, b: jnp.einsum("blD,ND->blN", t, w) + b
    q = lin(x, params["wq"], params["bq"])
    k = lin(x, params["wk"], params["bk"])
    v = lin(x, params["wv"], params["bv"])
    wiq, wik, wiv = jnp.split(params["in_proj_weight"], 3, axis=0)
    biq, bik, biv = jnp.split(params["in_proj_bias"], 3)
    q2, k2, v2 = lin(q, wiq, biq), lin(k, wik, bik), lin(v, wiv, biv)
    B, L, _ = x.shape
    sh = lambda t: t.reshape(B, L, num_heads, Hd).transpose(0, 2, 1, 3)  # (B,H,L,Hd)
    qh, kh, vh = sh(q2) * scale, sh(k2), sh(v2)
    logits = jnp.einsum("bhqd,bhkd->bhqk", qh, kh)
    p = jax.nn.softmax(logits, axis=-1)
    attn = jnp.einsum("bhqk,bhkd->bhqd", p, vh).transpose(0, 2, 1, 3).reshape(B, L, N)
    out = lin(attn, params["out_proj_weight"], params["out_proj_bias"])
    # output.relu() is a no-op (not in-place) -> omitted.
    return lin(out, params["wl"], params["bl"])


def init_params(key, dim_input, num_neurons, dim_output):
    keys = jax.random.split(key, 12)
    n = lambda k, shape, s: (jax.random.normal(k, shape, jnp.float32) * s)
    return {
        "wq": n(keys[0], (num_neurons, dim_input), 0.1),
        "bq": n(keys[1], (num_neurons,), 0.1),
        "wk": n(keys[2], (num_neurons, dim_input), 0.1),
        "bk": n(keys[3], (num_neurons,), 0.1),
        "wv": n(keys[4], (num_neurons, dim_input), 0.1),
        "bv": n(keys[5], (num_neurons,), 0.1),
        "in_proj_weight": n(keys[6], (3 * num_neurons, num_neurons), 0.1),
        "in_proj_bias":   n(keys[7], (3 * num_neurons,), 0.1),
        "out_proj_weight": n(keys[8], (num_neurons, num_neurons), 0.1),
        "out_proj_bias":   n(keys[9], (num_neurons,), 0.1),
        "wl": n(keys[10], (dim_output, num_neurons), 0.1),
        "bl": n(keys[11], (dim_output,), 0.1),
    }


if __name__ == "__main__":
    B, L = 2, 8
    dim_input, num_neurons, dim_output, num_heads = 16, 32, 16, 4

    key = jax.random.PRNGKey(0)
    kx, kp = jax.random.split(key)
    x = jax.random.normal(kx, (B, L, dim_input), jnp.float32)
    params = init_params(kp, dim_input, num_neurons, dim_output)

    out = multiheads_self_attention(x, params, num_heads)
    out = jax.block_until_ready(out)

    ref = reference(x, params, num_heads)
    assert out.shape == (B, L, dim_output)
    # bf16 MXU operands -> looser tolerance than pure-f32.
    assert jnp.allclose(out, ref, rtol=2e-2, atol=2e-2), "mismatch vs reference"
    print("KERNEL_OK")
</pallas_src>

<mosaic_0001>
module attributes {stable_mosaic.version = 11 : i64} {
  func.func @mhsa_kernel(%arg0: i32, %arg1: memref<1x8x128xbf16, #tpu.memory_space<vmem>>, %arg2: memref<128x96xbf16, #tpu.memory_space<vmem>>, %arg3: memref<1x96xf32, #tpu.memory_space<vmem>>, %arg4: memref<4x8x128xbf16, #tpu.memory_space<vmem>>, %arg5: memref<1x128xf32, #tpu.memory_space<vmem>>, %arg6: memref<1x8x128xf32, #tpu.memory_space<vmem>>) attributes {dimension_semantics = [#tpu.dimension_semantics<parallel>], iteration_bounds = array<i64: 2>, scalar_prefetch = 0 : i64, scratch_operands = 0 : i64, tpu.core_type = #tpu.core_type<tc>, window_params = [{transform_indices = @transform_0, window_bounds = array<i64: 1, 8, 128>}, {pipeline_mode = #tpu.pipeline_mode<synchronous>, transform_indices = @transform_1, window_bounds = array<i64: 128, 96>}, {pipeline_mode = #tpu.pipeline_mode<synchronous>, transform_indices = @transform_2, window_bounds = array<i64: 1, 96>}, {pipeline_mode = #tpu.pipeline_mode<synchronous>, transform_indices = @transform_3, window_bounds = array<i64: 4, 8, 128>}, {pipeline_mode = #tpu.pipeline_mode<synchronous>, transform_indices = @transform_4, window_bounds = array<i64: 1, 128>}, {transform_indices = @transform_5, window_bounds = array<i64: 1, 8, 128>}]} {
    %c0 = arith.constant 0 : index
    %c0_0 = arith.constant 0 : index
    %c0_1 = arith.constant 0 : index
    %0 = vector.load %arg1[%c0, %c0_0, %c0_1] : memref<1x8x128xbf16, #tpu.memory_space<vmem>>, vector<1x8x128xbf16>
    %1 = vector.shape_cast %0 : vector<1x8x128xbf16> to vector<8x128xbf16>
    %c0_2 = arith.constant 0 : index
    %c0_3 = arith.constant 0 : index
    %2 = vector.load %arg2[%c0_2, %c0_3] : memref<128x96xbf16, #tpu.memory_space<vmem>>, vector<128x96xbf16>
    %cst = arith.constant dense<0.000000e+00> : vector<8x96xf32>
    %3 = tpu.matmul %1, %2, %cst {dimension_numbers = #tpu.dot_dimension_numbers<[1], [0], [0], [1], [0, 0, 1, 1], [], []>} : vector<8x128xbf16>, vector<128x96xbf16>, vector<8x96xf32> -> vector<8x96xf32>
    %c0_4 = arith.constant 0 : index
    %c0_5 = arith.constant 0 : index
    %4 = vector.load %arg3[%c0_4, %c0_5] : memref<1x96xf32, #tpu.memory_space<vmem>>, vector<1x96xf32>
    %5 = vector.broadcast %4 : vector<1x96xf32> to vector<8x96xf32>
    %6 = arith.addf %3, %5 : vector<8x96xf32>
    %7 = vector.extract_strided_slice %6 {offsets = [0, 0], sizes = [8, 8], strides = [1, 1]} : vector<8x96xf32> to vector<8x8xf32>
    %8 = vector.extract_strided_slice %6 {offsets = [0, 8], sizes = [8, 8], strides = [1, 1]} : vector<8x96xf32> to vector<8x8xf32>
    %9 = vector.extract_strided_slice %6 {offsets = [0, 16], sizes = [8, 8], strides = [1, 1]} : vector<8x96xf32> to vector<8x8xf32>
    %10 = vector.extract_strided_slice %6 {offsets = [0, 24], sizes = [8, 8], strides = [1, 1]} : vector<8x96xf32> to vector<8x8xf32>
    %11 = vector.shape_cast %7 : vector<8x8xf32> to vector<1x8x8xf32>
    %12 = vector.shape_cast %8 : vector<8x8xf32> to vector<1x8x8xf32>
    %13 = vector.shape_cast %9 : vector<8x8xf32> to vector<1x8x8xf32>
    %14 = vector.shape_cast %10 : vector<8x8xf32> to vector<1x8x8xf32>
    %15 = tpu.concatenate %11, %12, %13, %14 in 0 : vector<1x8x8xf32>, vector<1x8x8xf32>, vector<1x8x8xf32>, vector<1x8x8xf32> -> vector<4x8x8xf32>
    %16 = arith.truncf %15 : vector<4x8x8xf32> to vector<4x8x8xbf16>
    %17 = vector.extract_strided_slice %6 {offsets = [0, 32], sizes = [8, 8], strides = [1, 1]} : vector<8x96xf32> to vector<8x8xf32>
    %18 = vector.extract_strided_slice %6 {offsets = [0, 40], sizes = [8, 8], strides = [1, 1]} : vector<8x96xf32> to vector<8x8xf32>
    %19 = vector.extract_strided_slice %6 {offsets = [0, 48], sizes = [8, 8], strides = [1, 1]} : vector<8x96xf32> to vector<8x8xf32>
    %20 = vector.extract_strided_slice %6 {offsets = [0, 56], sizes = [8, 8], strides = [1, 1]} : vector<8x96xf32> to vector<8x8xf32>
    %21 = vector.shape_cast %17 : vector<8x8xf32> to vector<1x8x8xf32>
    %22 = vector.shape_cast %18 : vector<8x8xf32> to vector<1x8x8xf32>
    %23 = vector.shape_cast %19 : vector<8x8xf32> to vector<1x8x8xf32>
    %24 = vector.shape_cast %20 : vector<8x8xf32> to vector<1x8x8xf32>
    %25 = tpu.concatenate %21, %22, %23, %24 in 0 : vector<1x8x8xf32>, vector<1x8x8xf32>, vector<1x8x8xf32>, vector<1x8x8xf32> -> vector<4x8x8xf32>
    %26 = arith.truncf %25 : vector<4x8x8xf32> to vector<4x8x8xbf16>
    %27 = vector.extract_strided_slice %6 {offsets = [0, 64], sizes = [8, 8], strides = [1, 1]} : vector<8x96xf32> to vector<8x8xf32>
    %28 = vector.extract_strided_slice %6 {offsets = [0, 72], sizes = [8, 8], strides = [1, 1]} : vector<8x96xf32> to vector<8x8xf32>
    %29 = vector.extract_strided_slice %6 {offsets = [0, 80], sizes = [8, 8], strides = [1, 1]} : vector<8x96xf32> to vector<8x8xf32>
    %30 = vector.extract_strided_slice %6 {offsets = [0, 88], sizes = [8, 8], strides = [1, 1]} : vector<8x96xf32> to vector<8x8xf32>
    %31 = vector.shape_cast %27 : vector<8x8xf32> to vector<1x8x8xf32>
    %32 = vector.shape_cast %28 : vector<8x8xf32> to vector<1x8x8xf32>
    %33 = vector.shape_cast %29 : vector<8x8xf32> to vector<1x8x8xf32>
    %34 = vector.shape_cast %30 : vector<8x8xf32> to vector<1x8x8xf32>
    %35 = tpu.concatenate %31, %32, %33, %34 in 0 : vector<1x8x8xf32>, vector<1x8x8xf32>, vector<1x8x8xf32>, vector<1x8x8xf32> -> vector<4x8x8xf32>
    %36 = arith.truncf %35 : vector<4x8x8xf32> to vector<4x8x8xbf16>
    "tpu.trace_start"() <{level = 10 : i32, message = "hqd,hkd->hqk"}> : () -> ()
    %cst_6 = arith.constant dense<0.000000e+00> : vector<4x8x8xf32>
    %37 = tpu.matmul %16, %26, %cst_6 {dimension_numbers = #tpu.dot_dimension_numbers<[2], [2], [1], [1], [0, 0, 0, 1, 1, 1], [0], [0]>} : vector<4x8x8xbf16>, vector<4x8x8xbf16>, vector<4x8x8xf32> -> vector<4x8x8xf32>
    "tpu.trace_stop"() : () -> ()
    %cst_7 = arith.constant dense<0xFF800000> : vector<4x8xf32>
    %38 = vector.multi_reduction <maximumf>, %37, %cst_7 [2] : vector<4x8x8xf32> to vector<4x8xf32>
    %39 = vector.shape_cast %38 : vector<4x8xf32> to vector<4x8x1xf32>
    %40 = vector.broadcast %39 : vector<4x8x1xf32> to vector<4x8x8xf32>
    %41 = arith.subf %37, %40 : vector<4x8x8xf32>
    %42 = math.exp %41 : vector<4x8x8xf32>
    %cst_8 = arith.constant dense<0.000000e+00> : vector<4x8xf32>
    %43 = vector.multi_reduction <add>, %42, %cst_8 [2] : vector<4x8x8xf32> to vector<4x8xf32>
    %44 = vector.shape_cast %43 : vector<4x8xf32> to vector<4x8x1xf32>
    %45 = tpu.reciprocal %44 {approx = true} : vector<4x8x1xf32> -> vector<4x8x1xf32>
    %46 = vector.broadcast %45 : vector<4x8x1xf32> to vector<4x8x8xf32>
    %47 = arith.mulf %42, %46 : vector<4x8x8xf32>
    %48 = arith.truncf %47 : vector<4x8x8xf32> to vector<4x8x8xbf16>
    "tpu.trace_start"() <{level = 10 : i32, message = "hqk,hkd->hqd"}> : () -> ()
    %cst_9 = arith.constant dense<0.000000e+00> : vector<4x8x8xf32>
    %49 = tpu.matmul %48, %36, %cst_9 {dimension_numbers = #tpu.dot_dimension_numbers<[2], [1], [1], [2], [0, 0, 0, 1, 1, 2], [0], [0]>} : vector<4x8x8xbf16>, vector<4x8x8xbf16>, vector<4x8x8xf32> -> vector<4x8x8xf32>
    "tpu.trace_stop"() : () -> ()
    %50 = arith.truncf %49 : vector<4x8x8xf32> to vector<4x8x8xbf16>
    %c0_10 = arith.constant 0 : index
    %c0_11 = arith.constant 0 : index
    %c0_12 = arith.constant 0 : index
    %51 = vector.load %arg4[%c0_10, %c0_11, %c0_12] : memref<4x8x128xbf16, #tpu.memory_space<vmem>>, vector<4x8x128xbf16>
    "tpu.trace_start"() <{level = 10 : i32, message = "hqd,hdo->hqo"}> : () -> ()
    %cst_13 = arith.constant dense<0.000000e+00> : vector<4x8x128xf32>
    %52 = tpu.matmul %50, %51, %cst_13 {dimension_numbers = #tpu.dot_dimension_numbers<[2], [1], [1], [2], [0, 0, 0, 1, 1, 2], [0], [0]>} : vector<4x8x8xbf16>, vector<4x8x128xbf16>, vector<4x8x128xf32> -> vector<4x8x128xf32>
    "tpu.trace_stop"() : () -> ()
    %cst_14 = arith.constant dense<0.000000e+00> : vector<8x128xf32>
    %53 = vector.multi_reduction <add>, %52, %cst_14 [0] : vector<4x8x128xf32> to vector<8x128xf32>
    %c0_15 = arith.constant 0 : index
    %c0_16 = arith.constant 0 : index
    %54 = vector.load %arg5[%c0_15, %c0_16] : memref<1x128xf32, #tpu.memory_space<vmem>>, vector<1x128xf32>
    %55 = vector.broadcast %54 : vector<1x128xf32> to vector<8x128xf32>
    %56 = arith.addf %53, %55 : vector<8x128xf32>
    %c0_17 = arith.constant 0 : index
    %c0_18 = arith.constant 0 : index
    %c0_19 = arith.constant 0 : index
    %57 = vector.load %arg6[%c0_17, %c0_18, %c0_19] : memref<1x8x128xf32, #tpu.memory_space<vmem>>, vector<1x8x128xf32>
    %58 = vector.shape_cast %57 : vector<1x8x128xf32> to vector<8x128xf32>
    %59 = vector.shape_cast %56 : vector<8x128xf32> to vector<1x8x128xf32>
    tpu.vector_store %arg6[%c0_17, %c0_18, %c0_19], %59 {strides = array<i32>} : memref<1x8x128xf32, #tpu.memory_space<vmem>>, vector<1x8x128xf32>,
    return
  }
  func.func @transform_0(%arg0: i32) -> (i32, i32, i32) {
    %c0_i32 = arith.constant 0 : i32
    %c0_i32_0 = arith.constant 0 : i32
    %c0_i32_1 = arith.constant 0 : i32
    return %arg0, %c0_i32, %c0_i32_0 : i32, i32, i32
  }
  func.func @transform_1(%arg0: i32) -> (i32, i32) {
    %c0_i32 = arith.constant 0 : i32
    %c0_i32_0 = arith.constant 0 : i32
    %c0_i32_1 = arith.constant 0 : i32
    return %c0_i32, %c0_i32_0 : i32, i32
  }
  func.func @transform_2(%arg0: i32) -> (i32, i32) {
    %c0_i32 = arith.constant 0 : i32
    %c0_i32_0 = arith.constant 0 : i32
    %c0_i32_1 = arith.constant 0 : i32
    return %c0_i32, %c0_i32_0 : i32, i32
  }
  func.func @transform_3(%arg0: i32) -> (i32, i32, i32) {
    %c0_i32 = arith.constant 0 : i32
    %c0_i32_0 = arith.constant 0 : i32
    %c0_i32_1 = arith.constant 0 : i32
    %c0_i32_2 = arith.constant 0 : i32
    return %c0_i32, %c0_i32_0, %c0_i32_1 : i32, i32, i32
  }
  func.func @transform_4(%arg0: i32) -> (i32, i32) {
    %c0_i32 = arith.constant 0 : i32
    %c0_i32_0 = arith.constant 0 : i32
    %c0_i32_1 = arith.constant 0 : i32
    return %c0_i32, %c0_i32_0 : i32, i32
  }
  func.func @transform_5(%arg0: i32) -> (i32, i32, i32) {
    %c0_i32 = arith.constant 0 : i32
    %c0_i32_0 = arith.constant 0 : i32
    %c0_i32_1 = arith.constant 0 : i32
    return %arg0, %c0_i32, %c0_i32_0 : i32, i32, i32
  }
}

</mosaic_0001>

<bundles_post_ra>
// kernel: tpu_custom_call.1
= control target key start
LH: loop header
LB: loop body
LE: loop exit
PB: predicated region body
PF: predicated region fallthrough
CT: control target
= control target key end

     0   :  { %10 = vsyncpa [#allocation3], 0  ;;  %s1630_s0 = inlined_call_operand.vmem [shape: bf16[2,8,128], index: 0, kind: input, shape index: {}]   ;;  %s1631_s1 = inlined_call_operand.vmem [shape: bf16[128,96], index: 1, kind: input, shape index: {}]   ;;  %s1632_s2 = inlined_call_operand.vmem [shape: f32[1,96], index: 2, kind: input, shape index: {}]   ;;  %s1633_s3 = inlined_call_operand.vmem [shape: bf16[4,8,128], index: 3, kind: input, shape index: {}]   ;;  %s1634_s4 = inlined_call_operand.vmem [shape: f32[1,128], index: 4, kind: input, shape index: {}]   ;;  %s1635_s5 = inlined_call_operand.hbm [shape: f32[2,8,128], index: 5, kind: output, shape index: {}]  }
   0x1   :  { %12 = vsyncpa [#allocation3 + $0x1], 0  ;;  %s1391_s18 = smov 0   ;;  %s1393_s19 = smov 0  }
   0x2   :  { %s1395_s20 = smov 0   ;;  %s1397_s21 = smov 0  }
   0x3 LB: > { %s1412_s22 = sadd.s32 4294967295, %s1351_s21   ;;  %s1062_s23 = sadd.s32 4294967294, %s1351_s21   ;;  %s1351_s21 = sphi %s1397_s21, %s1641_s21   ;;  %s1347_s20 = sphi %s1395_s20, %s1640_s20   ;;  %s1343_s19 = sphi %s1393_s19, %s1639_s19   ;;  %s1339_s18 = sphi %s1391_s18, %s1638_s18  }
   0x4   : > { %s1416_s24 = sadd.s32 1, %s1351_s21   ;;  %s135_s25 = sadd.s32 1, %s1347_s20 }
   0x5   : > { %s132_s26 = ssub.s32 %s1351_s21, %s1416_s24  ;;  %p145_p0 = scmp.ne.s32.totalorder %s1347_s20, %s1343_s19 }
   0x6   : > { %p133_p1 = scmp.eq.s32.totalorder %s132_s26, 0  ;;  %p146_p2 = scmp.eq.s32.totalorder %s1412_s22, 1 }
   0x7   : > { %p151_p3 = scmp.ne.s32.totalorder %s1343_s19, %s1339_s18  ;;  %p152_p4 = scmp.eq.s32.totalorder %s1062_s23, 1 }
   0x8   : > { %s1427_s27 = scalar_select %p133_p1, %s1347_s20, %s135_s25  }
   0x9   : > { %p1429_p5 = por %p146_p2, %p145_p0  ;;  %p1433_p6 = por %p152_p4, %p151_p3 }
   0xa   : > { %p1065_p7 = scmp.ge.s32.totalorder %s1351_s21, 1  ;;  %p189_p8 = scmp.lt.s32.totalorder %s1351_s21, 3 }
   0xc   : > { %p190_p9 = pnand %p1065_p7, %p189_p8 }
   0xd   : > { %v1265_v0 = vld [vmem:[%s1631_s1] sm:$0xff] (!%p190_p9)   ;;  %v1353_v1 = vmov (!%p190_p9), 0.0   ;;  %v1266_v2 = vld [vmem:[%s1631_s1 + $0x8] sm:$0xff] (!%p190_p9)   ;;  %vm1354_vm0 = vmmov (!%p190_p9), 0   ;;  %v1267_v3 = vld [vmem:[%s1631_s1 + $0x10] sm:$0xff] (!%p190_p9)   ;;  %p216_p10 = scmp.lt.s32.totalorder (!%p190_p9), %s1412_s22, 1 }
   0xe   : > { %193 = sbr.rel (%p190_p9) target bundleno = 1488 (0x5d0), region = 40  ;;  %1127 = vmatprep.subr.bf16.mxu0 (!%p190_p9), %v1353_v1  ;;  %1147 = vmatprep.subr.bf16.mxu1 (!%p190_p9), %v1353_v1  ;;  %v1268_v4 = vld [vmem:[%s1631_s1 + $0x18] sm:$0xff] (!%p190_p9)   ;;  %v1269_v5 = vld [vmem:[%s1631_s1 + $0x20] sm:$0xff] (!%p190_p9)   ;;  %v1270_v6 = vld [vmem:[%s1631_s1 + $0x28] sm:$0xff] (!%p190_p9)   ;;  %s1355_s12 = smov (!%p190_p9), 104   ;;  %vm350_vm1 = vcmask (!%p190_p9), 64512  }
   0xf   : > { %1128 = vmatpush3.bf16.msra.mxu0 (!%p190_p9), %v1265_v0  ;;  %1143 = vmatprep.mubr.msk.bf16.mxu0 (!%p190_p9), %vm1354_vm0, %v1353_v1  ;;  %v1271_v7 = vld [vmem:[%s1631_s1 + $0x30] sm:$0xff] (!%p190_p9)   ;;  %v1272_v8 = vld [vmem:[%s1631_s1 + $0x38] sm:$0xff] (!%p190_p9)   ;;  %v1068_v10 = vld [vmem:[%s1632_s2] ss:$0 sm:$0xff] (!%p190_p9)  ;;  %s1356_s13 = smov (!%p190_p9), 120   ;;  %s1357_s14 = smov (!%p190_p9), 112  }
  0x10   : > { %1129 = vmatprep.subr.bf16.mxu0 (!%p190_p9), %v1353_v1  ;;  %1149 = vmatprep.mubr.msk.bf16.mxu1 (!%p190_p9), %vm1354_vm0, %v1353_v1  ;;  %s1358_s15 = smov (!%p190_p9), 96   ;;  %s1359_s16 = smov (!%p190_p9), 64   ;;  %vm597_vm2 = vcmask (!%p190_p9), 1043456  }
  0x13   : > { %1130 = vmatpush3.bf16.msra.mxu0 (!%p190_p9), %v1266_v2 }
  0x14   : > { %1131 = vmatprep.subr.bf16.mxu0 (!%p190_p9), %v1353_v1 }
  0x15   : > { %s217_s17 = scalar_select %p216_p10, %s1412_s22, 1 }
  0x17   : > { %1132 = vmatpush3.bf16.msra.mxu0 %v1267_v3  ;;  %s1067_s26 = sshll.u32 %s217_s17, 2 }
  0x18   : > { %1133 = vmatprep.subr.bf16.mxu0 %v1353_v1  ;;  %s219_s9 = scalar_lea.vmem %s1630_s0, %s1067_s26  ;;  %s1360_s26 = smov [#allocation2]  }
  0x19   : > { %v221_v9 = vld [vmem:[%s219_s9] sm:$0xf]  ;;  %s213_s9 = sand.u32 1, %s1343_s19   ;;  %s1293_s30 = sshll.u32 %s1360_s26, 4  ;;  %s1294_s30 = int_to_ptr.vmem [resolvable:$false] %s1293_s30 }
  0x1a   : > { %s1066_s10 = sshll.u32 %s213_s9, 3  ;;  %s990_s25 = scalar_lea.sflag [#allocation3], %s213_s9 }
  0x1b   : > { %1134 = vmatpush3.bf16.msra.mxu0 %v1268_v4  ;;  %s1295_s6 = scalar_lea.vmem %s1294_s30, 256 }
  0x1c   : > { %1135 = vmatprep.subr.bf16.mxu0 %v1353_v1 }
  0x1f   : > { %1136 = vmatpush3.bf16.msra.mxu0 %v1269_v5 }
  0x20   : > { %1137 = vmatprep.subr.bf16.mxu0 %v1353_v1 }
  0x23   : > { %1138 = vmatpush3.bf16.msra.mxu0 %v1270_v6 }
  0x24   : > { %1139 = vmatprep.subr.bf16.mxu0 %v1353_v1 }
  0x27   : > { %1140 = vmatpush3.bf16.msra.mxu0 %v1271_v7 }
  0x28   : > { %1141 = vmatprep.subr.bf16.mxu0 %v1353_v1 }
  0x2b   : > { %1142 = vmatpush3.bf16.msra.mxu0 %v1272_v8 }
  0x2c   : > { %1171 = vmatprep.subr.bf16.mxu0 %v1353_v1 }
  0x2e   : > { %1144 = vmatmul.mubr.bf16.vlgmr.msra.gmra.mrb[0].mxu0 %v221_v9 }
  0x2f   : > { %1173 = vmatprep.mubr.msk.bf16.mxu0 %vm1354_vm0, %v1353_v1 }
 0x101   : > { %v327_v11 = vpop.f32.mrb[0].mxu0 }
 0x102   : > { %v328_v12 = vadd.f32 %v1068_v10, %v327_v11  ;;  %v1145_v13 = vpop.f32.mrb[1].mxu0 }
 0x103   : > { %v330_v14 = vpop.f32.mrb[2].mxu0 }
 0x104   : > { %340 = vrot.lane.b32.xlu1 %v328_v12, %s1355_s12  ;;  %334 = vrot.lane.b32.xlu0 %v328_v12, %s1356_s13  ;;  %v1146_v15 = vpop.f32.mrb[3].mxu0  ;;  %v1487_v16 = vpack.c.bf16 %v328_v12, %v328_v12  ;;  %s1091_s13 = sshll.u32 %s1412_s22, 7 }
 0x105   : > { %s1588_s23 = scalar_lea.hbm %s1635_s5, %s1091_s13 }
 0x108   : > { %337 = vrot.lane.b32.xlu0 %v328_v12, %s1357_s14  ;;  %348 = vrot.lane.b32.xlu1 %v1487_v16, %s1358_s15  ;;  %s215_s14 = scalar_lea.vmem [#allocation2], %s1066_s10 }
 0x176   : > { %v341_v17 = vpop.permute.xlu1 %340  ;;  %v335_v18 = vpop.permute.xlu0 %334 }
 0x177   : > { %v344_v19 = vpack.c.bf16 %v335_v18, %v335_v18  ;;  %v1490_v22 = vpack.c.bf16 %v341_v17, %v341_v17 }
 0x179   : > { %398 = vrot.lane.b32.xlu0 %v344_v19, %s1358_s15 }
 0x17a   : > { %v338_v20 = vpop.permute.xlu0 %337  ;;  %v349_v21 = vpop.permute.xlu1 %348 }
 0x17b   : > { %v1492_v23 = vpack.c.bf16 %v338_v20, %v338_v20  ;;  %v355_v24 = vsel %vm350_vm1, %v349_v21, 0 }
 0x17c   : > { %1148 = vmatpush3.bf16.xpose.msra.mxu1 %v355_v24 }
 0x17d   : > { %496 = vrot.lane.b32.xlu0 %v1490_v22, %s1358_s15  ;;  %447 = vrot.lane.b32.xlu1 %v1492_v23, %s1358_s15  ;;  %s1003_s15 = sshll.u32 %s215_s14, 4  ;;  %s1590_s15 = int_to_ptr.vmem [resolvable:$true] %s1003_s15 }
 0x17e   : > { %1153 = vmatprep.subr.bf16.mxu1 %v1353_v1  ;;  %s1289_s22 = scalar_lea.vmem %s1590_s15, 128  ;;  %p1296_p0 = scmp.lt.s32.totalorder %s1590_s15, %s1294_s30 }
 0x17f   : > { %p1290_p11 = scmp.ne.s32.totalorder %s1590_s15, %s1289_s22  ;;  %p1297_p1 = scmp.lt.s32.totalorder %s1295_s6, %s1289_s22 }
 0x181   : > { %p1291_p12 = pnand %p1290_p11, %p1429_p5  ;;  %p1298_p2 = por %p1297_p1, %p1296_p0 }
 0x183   : > { %1150 = vmatmul.mubr.msk.bf16.vlgmr.msra.gmra.mrb[0].mxu1 %vm350_vm1, %v1487_v16  ;;  %p1292_p13 = pneg %p1291_p12 }
 0x184   : > { %1155 = vmatprep.mubr.msk.bf16.mxu1 %vm1354_vm0, %v1353_v1 }
 0x185   : > { %p1299_p3 = pnand %p1298_p2, %p1292_p13 }
 0x1eb   : > { %v399_v25 = vpop.permute.xlu0 %398 }
 0x1ec   : > { %v404_v26 = vsel %vm350_vm1, %v399_v25, 0 }
 0x1ed   : > { %1154 = vmatpush3.bf16.xpose.msra.mxu1 %v404_v26 }
 0x1ee   : > { %1159 = vmatprep.subr.bf16.mxu1 %v1353_v1 }
 0x1ef   : > { %v448_v27 = vpop.permute.xlu1 %447  ;;  %v497_v29 = vpop.permute.xlu0 %496 }
 0x1f0   : > { %v453_v28 = vsel %vm350_vm1, %v448_v27, 0  ;;  %v502_v30 = vsel %vm350_vm1, %v497_v29, 0  ;;  %v789_v27 = vld [vmem:[%s1633_s3] sm:$0xf] }
 0x1f4   : > { %1156 = vmatmul.mubr.msk.bf16.vlgmr.msra.gmra.mrb[4].mxu1 %vm350_vm1, %v344_v19 }
 0x1f5   : > { %1160 = vmatpush3.bf16.xpose.msra.mxu1 %v453_v28  ;;  %1161 = vmatprep.mubr.msk.bf16.mxu1 %vm1354_vm0, %v1353_v1 }
 0x1f6   : > { %1165 = vmatprep.subr.bf16.mxu1 %v1353_v1 }
 0x1fc   : > { %1162 = vmatmul.mubr.msk.bf16.vlgmr.msra.gmra.mrb[8].mxu1 %vm350_vm1, %v1492_v23 }
 0x1fd   : > { %1166 = vmatpush3.bf16.xpose.msra.mxu1 %v502_v30  ;;  %1167 = vmatprep.mubr.msk.bf16.mxu1 %vm1354_vm0, %v1353_v1  ;;  %v797_v30 = vsel %vm597_vm2, %v789_v27, 0 }
 0x1fe   : > { %1177 = vmatprep.subr.bf16.mxu1 %v1353_v1 }
 0x204   : > { %1168 = vmatmul.mubr.msk.bf16.vlgmr.msra.gmra.mrb[12].mxu1 %vm350_vm1, %v1490_v22 }
 0x205   : > { %1179 = vmatprep.mubr.msk.bf16.mxu1 %vm1354_vm0, %v1353_v1 }
 0x256   : > { %v391_v31 = vpop.f32.mrb[0].mxu1 }
 0x257   : > { %v1151_v32 = vpop.f32.mrb[1].mxu1  ;;  %v544_v33 = vsel %vm350_vm1, %v391_v31, -inf }
 0x258   : > { %545 = vmax.xlane.f32.xlu1 %v544_v33  ;;  %v394_v34 = vpop.f32.mrb[2].mxu1 }
 0x259   : > { %v1152_v35 = vpop.f32.mrb[3].mxu1  ;;  %v790_v34 = vld [vmem:[%s1633_s3 + $0x4] sm:$0xf] }
 0x25a   : > { %v843_v35 = vsel %vm597_vm2, %v790_v34, 0 }
 0x2c7   : > { %v440_v36 = vpop.f32.mrb[4].mxu1 }
 0x2c8   : > { %v1157_v37 = vpop.f32.mrb[5].mxu1  ;;  %v547_v38 = vsel %vm350_vm1, %v440_v36, -inf }
 0x2c9   : > { %548 = vmax.xlane.f32.xlu0 %v547_v38  ;;  %v443_v39 = vpop.f32.mrb[6].mxu1 }
 0x2ca   : > { %v1158_v40 = vpop.f32.mrb[7].mxu1 }
 0x2cf   : > { %v489_v41 = vpop.f32.mrb[8].mxu1 }
 0x2d0   : > { %v1163_v42 = vpop.f32.mrb[9].mxu1  ;;  %v550_v43 = vsel %vm350_vm1, %v489_v41, -inf }
 0x2d1   : > { %551 = vmax.xlane.f32.xlu0 %v550_v43  ;;  %v492_v44 = vpop.f32.mrb[10].mxu1  ;;  %v792_v43 = vld [vmem:[%s1633_s3 + $0xc] sm:$0xf] }
 0x2d2   : > { %v1164_v45 = vpop.f32.mrb[11].mxu1 }
 0x2d7   : > { %v538_v46 = vpop.f32.mrb[12].mxu1 }
 0x2d8   : > { %v1169_v47 = vpop.f32.mrb[13].mxu1  ;;  %v553_v48 = vsel %vm350_vm1, %v538_v46, -inf }
 0x2d9   : > { %554 = vmax.xlane.f32.xlu1 %v553_v48  ;;  %v541_v49 = vpop.f32.mrb[14].mxu1  ;;  %v935_v47 = vsel %vm597_vm2, %v792_v43, 0 }
 0x2da   : > { %v1170_v50 = vpop.f32.mrb[15].mxu1 }
 0x2e5   : > { %v546_v51 = vpop.xlane.xlu1 %545 }
 0x2e6   : > { %v556_v52 = vsub.f32 %v391_v31, %v546_v51 }
 0x2e7   : > { %592 = vrot.lane.b32.xlu0 %v1487_v16, %s1359_s16 }
 0x2e8   : > { %v560_v53 = vmul.f32 1.442695, %v556_v52 }
 0x2ea   : > { %641 = vrot.lane.b32.xlu1 %v344_v19, %s1359_s16  ;;  %1273 = vpow2.f32 %v560_v53 }
 0x2f4   : > { %v1274_v54 = vpop.eup %1273 }
 0x2f5   : > { %v568_v55 = vsel %vm350_vm1, %v1274_v54, 0.0 }
 0x306   : > { %569 = vadd.xlane.f32.xlu0 %v568_v55 }
 0x356   : > { %v549_v56 = vpop.xlane.xlu0 %548 }
 0x357   : > { %v557_v57 = vsub.f32 %v440_v36, %v549_v56  ;;  %v791_v36 = vld [vmem:[%s1633_s3 + $0x8] sm:$0xf] }
 0x358   : > { %v889_v40 = vsel %vm597_vm2, %v791_v36, 0 }
 0x359   : > { %v562_v58 = vmul.f32 1.442695, %v557_v57 }
 0x35b   : > { %1275 = vpow2.f32 %v562_v58 }
 0x35e   : > { %v552_v59 = vpop.xlane.xlu0 %551 }
 0x35f   : > { %v558_v60 = vsub.f32 %v489_v41, %v552_v59 }
 0x361   : > { %v564_v61 = vmul.f32 1.442695, %v558_v60 }
 0x362   : > { %v593_v62 = vpop.permute.xlu0 %592 }
 0x363   : > { %1277 = vpow2.f32 %v564_v61  ;;  %v599_v63 = vsel %vm597_vm2, %v593_v62, 0 }
 0x364   : > { %1172 = vmatpush3.bf16.msra.mxu0 %v599_v63 }
 0x365   : > { %v1276_v0 = vpop.eup %1275  ;;  %1183 = vmatprep.subr.bf16.mxu0 %v1353_v1 }
 0x366   : > { %v555_v2 = vpop.xlane.xlu1 %554  ;;  %v571_v3 = vsel %vm350_vm1, %v1276_v0, 0.0 }
 0x367   : > { %v559_v4 = vsub.f32 %v538_v46, %v555_v2  ;;  %572 = vadd.xlane.f32.xlu1 %v571_v3 }
 0x369   : > { %v566_v5 = vmul.f32 1.442695, %v559_v4 }
 0x36a   : > { %v642_v6 = vpop.permute.xlu1 %641 }
 0x36b   : > { %1279 = vpow2.f32 %v566_v5  ;;  %v647_v7 = vsel %vm597_vm2, %v642_v6, 0 }
 0x36c   : > { %1178 = vmatpush3.bf16.msra.mxu1 %v647_v7 }
 0x36d   : > { %v1278_v8 = vpop.eup %1277  ;;  %1189 = vmatprep.subr.bf16.mxu1 %v1353_v1 }
 0x36e   : > { %v574_v9 = vsel %vm350_vm1, %v1278_v8, 0.0 }
 0x36f   : > { %575 = vadd.xlane.f32.xlu0 %v574_v9 }
 0x375   : > { %v1280_v10 = vpop.eup %1279 }
 0x376   : > { %v577_v11 = vsel %vm350_vm1, %v1280_v10, 0.0 }
 0x377   : > { %578 = vadd.xlane.f32.xlu1 %v577_v11  ;;  %v1089_v11 = vld [vmem:[%s1634_s4] ss:$0 sm:$0xff] }
 0x385   : > { %737 = vrot.lane.b32.xlu0 %v1490_v22, %s1359_s16 }
 0x388   : > { %689 = vrot.lane.b32.xlu1 %v1492_v23, %s1359_s16 }
 0x393   : > { %v570_v12 = vpop.xlane.xlu0 %569 }
 0x394   : > { %1281 = vrcp.f32 %v570_v12 }
 0x39e   : > { %v1282_v13 = vpop.eup %1281 }
 0x39f   : > { %v584_v14 = vmul.f32 %v1282_v13, %v1274_v54 }
 0x3a1   : > { %v588_v15 = vpack.c.bf16 %v584_v14, %v584_v14 }
 0x3a3   : > { %1174 = vmatmul.mubr.msk.bf16.vlgmr.msra.gmra.mrb[4].mxu0 %vm350_vm1, %v588_v15 }
 0x3a4   : > { %1185 = vmatprep.mubr.msk.bf16.mxu0 %vm1354_vm0, %v1353_v1 }
 0x3f4   : > { %v573_v16 = vpop.xlane.xlu1 %572 }
 0x3f5   : > { %1283 = vrcp.f32 %v573_v16 }
 0x3fc   : > { %v576_v17 = vpop.xlane.xlu0 %575 }
 0x3fd   : > { %1285 = vrcp.f32 %v576_v17 }
 0x3ff   : > { %v1284_v18 = vpop.eup %1283 }
 0x400   : > { %v585_v19 = vmul.f32 %v1284_v18, %v1276_v0  ;;  %v738_v20 = vpop.permute.xlu0 %737 }
 0x401   : > { %v743_v22 = vsel %vm597_vm2, %v738_v20, 0 }
 0x402   : > { %v589_v21 = vpack.c.bf16 %v585_v19, %v585_v19 }
 0x404   : > { %1180 = vmatmul.mubr.msk.bf16.vlgmr.msra.gmra.mrb[16].mxu1 %vm350_vm1, %v589_v21  ;;  %v579_v23 = vpop.xlane.xlu1 %578 }
 0x405   : > { %1190 = vmatpush3.bf16.msra.mxu1 %v743_v22  ;;  %1287 = vrcp.f32 %v579_v23  ;;  %1191 = vmatprep.mubr.msk.bf16.mxu1 %vm1354_vm0, %v1353_v1 }
 0x406   : > { %1201 = vmatprep.subr.bf16.mxu1 %v1353_v1 }
 0x407   : > { %v1286_v24 = vpop.eup %1285 }
 0x408   : > { %v586_v25 = vmul.f32 %v1286_v24, %v1278_v8  ;;  %v690_v26 = vpop.permute.xlu1 %689 }
 0x409   : > { %v695_v28 = vsel %vm597_vm2, %v690_v26, 0 }
 0x40a   : > { %1184 = vmatpush3.bf16.msra.mxu0 %v695_v28  ;;  %v590_v29 = vpack.c.bf16 %v586_v25, %v586_v25 }
 0x40b   : > { %1195 = vmatprep.subr.bf16.mxu0 %v1353_v1 }
 0x40d   : > { %1186 = vmatmul.mubr.msk.bf16.vlgmr.msra.gmra.mrb[8].mxu0 %vm350_vm1, %v590_v29 }
 0x40e   : > { %1196 = vmatpush3.bf16.msra.mxu0 %v797_v30  ;;  %1197 = vmatprep.mubr.msk.bf16.mxu0 %vm1354_vm0, %v1353_v1 }
 0x40f   : > { %v1288_v31 = vpop.eup %1287  ;;  %1207 = vmatprep.subr.bf16.mxu0 %v1353_v1 }
 0x410   : > { %v587_v32 = vmul.f32 %v1288_v31, %v1280_v10 }
 0x412   : > { %v591_v33 = vpack.c.bf16 %v587_v32, %v587_v32 }
 0x414   : > { %1192 = vmatmul.mubr.msk.bf16.vlgmr.msra.gmra.mrb[20].mxu1 %vm350_vm1, %v591_v33 }
 0x415   : > { %1203 = vmatprep.mubr.msk.bf16.mxu1 %vm1354_vm0, %v1353_v1  ;;  %1202 = vmatpush3.bf16.msra.mxu1 %v843_v35 }
 0x416   : > { %1213 = vmatprep.subr.bf16.mxu1 %v1353_v1 }
 0x476   : > { %v635_v37 = vpop.f32.mrb[4].mxu0 }
 0x477   : > { %v785_v38 = vpack.c.bf16 %v635_v37, %v635_v37  ;;  %v1175_v39 = vpop.f32.mrb[5].mxu0 }
 0x478   : > { %v638_v41 = vpop.f32.mrb[6].mxu0 }
 0x479   : > { %v1176_v42 = vpop.f32.mrb[7].mxu0  ;;  %1198 = vmatmul.mubr.msk.bf16.vlgmr.msra.gmra.mrb[12].mxu0 %vm350_vm1, %v785_v38 }
 0x47a   : > { %1208 = vmatpush3.bf16.msra.mxu0 %v889_v40  ;;  %1209 = vmatprep.mubr.msk.bf16.mxu0 %vm1354_vm0, %v1353_v1 }
 0x4d7   : > { %v683_v44 = vpop.f32.mrb[16].mxu1 }
 0x4d8   : > { %v786_v45 = vpack.c.bf16 %v683_v44, %v683_v44  ;;  %v1181_v46 = vpop.f32.mrb[17].mxu1 }
 0x4d9   : > { %v686_v48 = vpop.f32.mrb[18].mxu1 }
 0x4da   : > { %v1182_v49 = vpop.f32.mrb[19].mxu1  ;;  %1204 = vmatmul.mubr.msk.bf16.vlgmr.msra.gmra.mrb[24].mxu1 %vm350_vm1, %v786_v45 }
 0x4db   : > { %1214 = vmatpush3.bf16.msra.mxu1 %v935_v47  ;;  %1215 = vmatprep.mubr.msk.bf16.mxu1 %vm1354_vm0, %v1353_v1 }
 0x4e0   : > { %v731_v50 = vpop.f32.mrb[8].mxu0 }
 0x4e1   : > { %v787_v51 = vpack.c.bf16 %v731_v50, %v731_v50  ;;  %v1187_v52 = vpop.f32.mrb[9].mxu0 }
 0x4e2   : > { %v734_v53 = vpop.f32.mrb[10].mxu0 }
 0x4e3   : > { %v1188_v54 = vpop.f32.mrb[11].mxu0  ;;  %1210 = vmatmul.mubr.msk.bf16.vlgmr.msra.gmra.mrb[16].mxu0 %vm350_vm1, %v787_v51 }
 0x4e7   : > { %v779_v55 = vpop.f32.mrb[20].mxu1 }
 0x4e8   : > { %v788_v56 = vpack.c.bf16 %v779_v55, %v779_v55  ;;  %v1193_v57 = vpop.f32.mrb[21].mxu1 }
 0x4e9   : > { %v782_v58 = vpop.f32.mrb[22].mxu1 }
 0x4ea   : > { %v1194_v59 = vpop.f32.mrb[23].mxu1  ;;  %1216 = vmatmul.mubr.msk.bf16.vlgmr.msra.gmra.mrb[28].mxu1 %vm350_vm1, %v788_v56 }
 0x54c   : > { %v833_v60 = vpop.f32.mrb[12].mxu0 }
 0x54d   : > { %v1199_v61 = vpop.f32.mrb[13].mxu0 }
 0x54e   : > { %v836_v62 = vpop.f32.mrb[14].mxu0 }
 0x54f   : > { %v1200_v1 = vpop.f32.mrb[15].mxu0 }
 0x5ad   : > { %v879_v63 = vpop.f32.mrb[24].mxu1 }
 0x5ae   : > { %v977_v0 = vadd.f32 %v879_v63, %v833_v60  ;;  %v1205_v2 = vpop.f32.mrb[25].mxu1 }
 0x5af   : > { %v882_v3 = vpop.f32.mrb[26].mxu1 }
 0x5b0   : > { %v1206_v4 = vpop.f32.mrb[27].mxu1 }
 0x5b6   : > { %v925_v5 = vpop.f32.mrb[16].mxu0 }
 0x5b7   : > { %v978_v6 = vadd.f32 %v977_v0, %v925_v5  ;;  %v1211_v7 = vpop.f32.mrb[17].mxu0 }
 0x5b8   : > { %v928_v8 = vpop.f32.mrb[18].mxu0 }
 0x5b9   : > { %v1212_v9 = vpop.f32.mrb[19].mxu0 }
 0x5bd   : > { %v971_v10 = vpop.f32.mrb[28].mxu1 }
 0x5be   : > { %v979_v12 = vadd.f32 %v978_v6, %v971_v10  ;;  %v1217_v13 = vpop.f32.mrb[29].mxu1 }
 0x5bf   : > { %v974_v14 = vpop.f32.mrb[30].mxu1 }
 0x5c0   : > { %v987_v15 = vadd.f32 %v1089_v11, %v979_v12  ;;  %v1218_v16 = vpop.f32.mrb[31].mxu1 }
 0x5c2   : > { %988 = vst [vmem:[%s215_s14] sm:$0xff] %v987_v15 }
 0x5c3   : > { %1302 = shalt.err (!%p1299_p3)
}
 0x5c4   : > { %s1303_s7 = scalar_lea.hbm %s1588_s23, 128  ;;  %s1307_s10 = scalar_lea.hbm %s1635_s5, 256 }
 0x5c5   : > { %p1304_p4 = scmp.ne.s32.totalorder %s1588_s23, %s1303_s7  ;;  %p1308_p9 = scmp.lt.u32.totalorder %s1588_s23, %s1635_s5 }
 0x5c6   : > { %p1309_p10 = scmp.lt.u32.totalorder %s1307_s10, %s1303_s7  ;;  %p1311_p12 = scmp.lt.u32.totalorder %s1303_s7, %s1588_s23 }
 0x5c7   : > { %p1305_p7 = pnand %p1304_p4, %p1429_p5 }
 0x5c8   : > { %p1310_p11 = por %p1309_p10, %p1308_p9 }
 0x5c9   : > { %p1306_p8 = pneg %p1305_p7 }
 0x5ca   : > { %p1312_p13 = por %p1311_p12, %p1310_p11 }
 0x5cc   : > { %p1313_p0 = pnand %p1312_p13, %p1306_p8 }
 0x5ce   : > { %1316 = shalt.err (!%p1313_p0)
}
 0x5cf   : > { %1219 = dma.vmem_to_hbm [thread:$0]  (%p1429_p5), %s1590_s15, 128, %s1588_s23, %s990_s25  }
 0x5d0 PF: > { %p1225_p1 = scmp.ge.s32.totalorder %s1351_s21, 2  ;;  %s1015_s13 = sand.u32 1, %s1339_s18  }
 0x5d1   : > { %s1016_s14 = scalar_lea.sflag [#allocation3], %s1015_s13 }
 0x5d2   : > { %p1222_p2 = pnand %p1225_p1, %p1433_p6 }
 0x5d4   : > { %1334 = dma.done.wait (!%p1222_p2), %s1016_s14, 128  }
 0x5d5   : > { %1336 = vsyncadd (!%p1222_p2), %s1016_s14, 4294967168  ;;  %p15_p3 = scmp.ge.s32.totalorder %s1416_s24, 4   ;;  %s1638_s18 = smov %s1343_s19 }
 0x5d6   : > { %s1639_s19 = smov %s1347_s20  ;;  %s1640_s20 = smov %s1427_s27 }
 0x5d7   : > { %s1641_s21 = smov %s1416_s24  ;;  %17 = sbr.rel (!%p15_p3) target bundleno = 3 (0x3), region = 75 }
 0x5de   :  { %1021 = vsyncpa [#allocation3], 1 }
 0x5df   :  { %1023 = vsyncpa [#allocation3 + $0x1], 1 }

</bundles_post_ra>
